<compile_context>
chip_gen: v7x
topology: tpu7x:2x2x1
jax: 0.10.0
libtpu: 0.0.40
codegen_flags: <defaults>
</compile_context>

<pallas_src>
import functools
import math

import jax
import jax.numpy as jnp
from jax import lax
from jax.experimental import pallas as pl
from jax.experimental.pallas import tpu as pltpu


def _round_up(n, m):
    return ((n + m - 1) // m) * m


def _baseline_kernel(x_ref, w1_ref, b1_ref, w2_ref, b2_ref, out_ref, *, chunk, nchunks):
    """One row-tile of the packed, block-diagonal MLP.

    x_ref  : [row_tb, G*D]   G batch elements packed per 128-lane row (lane-dense)
    w1_ref : [G*D, G*Hp]     block-diagonal fc1 weight (VMEM-resident across grid)
    b1_ref : [1,   G*Hp]     tiled fc1 bias (f32)
    w2_ref : [G*Hp, G]       block-diagonal fc2 weight (VMEM-resident)
    b2_ref : [1, 1]          fc2 bias scalar (SMEM)
    out_ref: [row_tb, G]     f32; row r, col g  ==  batch element r*G + g
    """
    b2 = b2_ref[0, 0]

    def one_chunk(r0):
        xc = x_ref[pl.ds(r0, chunk), :]                                    # [chunk, G*D]
        h = jnp.dot(xc, w1_ref[...], preferred_element_type=jnp.float32)   # MXU, f32 acc
        h = jnp.maximum(h + b1_ref[...], 0.0)                              # bias + ReLU (f32, VPU)
        h = h.astype(w2_ref.dtype)                                         # bf16 before fc2 matmul
        y = jnp.dot(h, w2_ref[...], preferred_element_type=jnp.float32)    # [chunk, G]
        out_ref[pl.ds(r0, chunk), :] = (y + b2).astype(out_ref.dtype)

    if nchunks == 1:
        one_chunk(0)
    else:
        def body(c, carry):
            one_chunk(pl.multiple_of(c * chunk, chunk))
            return carry
        lax.fori_loop(0, nchunks, body, 0, unroll=2)


def baseline_forward(x, w1, b1, w2, b2, plate_dims=1, *,
                     compute_dtype=jnp.bfloat16, max_rows_per_tile=4096):
    """Pallas port of Baseline.forward.

    x : [*plates, *in_dim]
    w1: [H, D] (fc1.weight)  b1: [H]     w2: [1, H] (fc2.weight)  b2: [1]
    returns [*plates] == fc2(relu(fc1(flatten(x)))).squeeze(-1)
    """
    plate_shape = x.shape[:plate_dims]
    B = math.prod(plate_shape) if plate_shape else 1
    x2d = x.reshape(B, -1)                       # reshape=True branch: flatten feature dims
    D = x2d.shape[1]
    H = w1.shape[0]

    # --- packing factor: G batch elements per 128-lane row ----------------------
    Hp = 64 if H <= 64 else _round_up(H, 8)      # pad H=50 -> 64 (full sublane grains)
    G = 128 // math.gcd(D, 128)
    G = max(1, min(G, 1024 // Hp))               # keep block-diag weights small & VMEM-resident

    GD, GH = G * D, G * Hp
    B_pad = _round_up(B, G)
    if B_pad != B:
        # TODO(synk): tail pad copies x once; a tiny remainder kernel would avoid it.
        x2d = jnp.pad(x2d, ((0, B_pad - B), (0, 0)))
    rows = B_pad // G
    x_packed = x2d.reshape(rows, GD).astype(compute_dtype)
    # (If x already arrives in `compute_dtype` upstream the cast is a no-op; standalone
    #  it is one cheap streaming pass that halves the kernel's dominant HBM read.)

    # --- block-diagonal weights (tiny; in a real module build these once at init) ---
    eye_g = jnp.eye(G, dtype=jnp.float32)
    w1t = jnp.pad(w1.T.astype(jnp.float32), ((0, 0), (0, Hp - H)))            # [D, Hp]
    w1_bd = (eye_g[:, None, :, None] * w1t[None, :, None, :]).reshape(GD, GH)
    b1_bd = jnp.tile(jnp.pad(b1.astype(jnp.float32), (0, Hp - H)), G).reshape(1, GH)
    w2p = jnp.pad(w2.reshape(-1).astype(jnp.float32), (0, Hp - H))            # [Hp]
    w2_bd = (eye_g[:, None, :] * w2p[None, :, None]).reshape(GH, G)
    w1_bd = w1_bd.astype(compute_dtype)
    w2_bd = w2_bd.astype(compute_dtype)
    b2_s = b2.reshape(1, 1).astype(jnp.float32)

    # --- row tiling --------------------------------------------------------------
    # 4096 rows (~32K batch elems): x 2x1 MiB + out 2x2 MiB + resident weights +
    # chunked activations ~= 8 MiB VMEM -> fits v5e/v6e/v7x under the 32 MiB limit below.
    if rows > max_rows_per_tile:
        row_tb = max_rows_per_tile               # multiple of 8; ragged tail handled by Pallas
    elif rows >= 512 and rows % 16 == 0:
        row_tb = rows // 2                       # >=2 grid blocks so v7x's two TCs both work
    else:
        row_tb = rows                            # single exact block (tiny-B path)
    chunk = next((c for c in (64, 32, 16, 8) if row_tb % c == 0), row_tb)
    nchunks = row_tb // chunk
    num_tiles = pl.cdiv(rows, row_tb)

    kernel = functools.partial(_baseline_kernel, chunk=chunk, nchunks=nchunks)
    out = pl.pallas_call(
        kernel,
        out_shape=jax.ShapeDtypeStruct((rows, G), jnp.float32),
        grid=(num_tiles,),
        in_specs=[
            pl.BlockSpec((row_tb, GD), lambda i: (i, 0)),           # packed x tile (lane-dense)
            pl.BlockSpec((GD, GH), lambda i: (0, 0)),               # block-diag fc1 w, resident
            pl.BlockSpec((1, GH), lambda i: (0, 0)),                # tiled fc1 bias, resident
            pl.BlockSpec((GH, G), lambda i: (0, 0)),                # block-diag fc2 w, resident
            pl.BlockSpec(memory_space=pltpu.MemorySpace.SMEM),      # fc2 bias scalar in SMEM
        ],
        out_specs=pl.BlockSpec((row_tb, G), lambda i: (i, 0)),
        compiler_params=pltpu.CompilerParams(
            dimension_semantics=("parallel",),
            vmem_limit_bytes=32 * 1024 * 1024,
        ),
    )(x_packed, w1_bd, b1_bd, w2_bd, b2_s)

    return out.reshape(B_pad)[:B].reshape(plate_shape)


def _ref_forward(x, w1, b1, w2, b2, plate_dims=1):
    plate_shape = x.shape[:plate_dims]
    xf = x.reshape(plate_shape + (-1,))
    h = jnp.maximum(xf @ w1.T + b1, 0.0)
    return (h @ w2.T + b2).squeeze(-1)


if __name__ == "__main__":
    key = jax.random.PRNGKey(0)
    # in_dim = (4, 4) -> reshape branch, D = 16; hidden H = 50 (per module)
    B, in_dim, H = 8, (4, 4), 50
    D = in_dim[0] * in_dim[1]

    kx, k1, k2, k3, k4 = jax.random.split(key, 5)
    x = jax.random.normal(kx, (B,) + in_dim, dtype=jnp.float32)

    # Deterministic parameter init (PyTorch-Linear-style uniform bounds, PyTorch layout)
    bound1 = 1.0 / math.sqrt(D)
    bound2 = 1.0 / math.sqrt(H)
    w1 = jax.random.uniform(k1, (H, D), jnp.float32, -bound1, bound1)   # fc1.weight
    b1 = jax.random.uniform(k2, (H,), jnp.float32, -bound1, bound1)     # fc1.bias
    w2 = jax.random.uniform(k3, (1, H), jnp.float32, -bound2, bound2)   # fc2.weight
    b2 = jax.random.uniform(k4, (1,), jnp.float32, -bound2, bound2)     # fc2.bias

    y_ref = _ref_forward(x, w1, b1, w2, b2, plate_dims=1)

    # Exact-parity check: f32 operands end-to-end.
    y_f32 = jax.block_until_ready(
        baseline_forward(x, w1, b1, w2, b2, plate_dims=1, compute_dtype=jnp.float32))
    assert y_f32.shape == (B,), y_f32.shape
    assert jnp.allclose(y_f32, y_ref, atol=1e-4, rtol=1e-4), (y_f32, y_ref)

    # Default (performance) path: bf16 MXU operands, f32 accumulate -> loose tolerance.
    y = jax.block_until_ready(baseline_forward(x, w1, b1, w2, b2, plate_dims=1))
    assert y.shape == (B,), y.shape
    assert jnp.allclose(y, y_ref, atol=5e-2, rtol=5e-2), (y, y_ref)

    print("KERNEL_OK")
</pallas_src>

<mosaic_0001>
module attributes {stable_mosaic.version = 11 : i64} {
  func.func @_baseline_kernel(%arg0: i32, %arg1: memref<1x128xf32, #tpu.memory_space<vmem>>, %arg2: memref<128x512xf32, #tpu.memory_space<vmem>>, %arg3: memref<1x512xf32, #tpu.memory_space<vmem>>, %arg4: memref<512x8xf32, #tpu.memory_space<vmem>>, %arg5: memref<1x1xf32, #tpu.memory_space<smem>>, %arg6: memref<1x8xf32, #tpu.memory_space<vmem>>) attributes {dimension_semantics = [#tpu.dimension_semantics<parallel>], iteration_bounds = array<i64: 1>, scalar_prefetch = 0 : i64, scratch_operands = 0 : i64, tpu.core_type = #tpu.core_type<tc>, window_params = [{transform_indices = @transform_0, window_bounds = array<i64: 1, 128>}, {pipeline_mode = #tpu.pipeline_mode<synchronous>, transform_indices = @transform_1, window_bounds = array<i64: 128, 512>}, {pipeline_mode = #tpu.pipeline_mode<synchronous>, transform_indices = @transform_2, window_bounds = array<i64: 1, 512>}, {pipeline_mode = #tpu.pipeline_mode<synchronous>, transform_indices = @transform_3, window_bounds = array<i64: 512, 8>}, {transform_indices = @transform_4, window_bounds = array<i64: 1, 1>}, {transform_indices = @transform_5, window_bounds = array<i64: 1, 8>}]} {
    %c0 = arith.constant 0 : index
    %c0_0 = arith.constant 0 : index
    %0 = memref.load %arg5[%c0, %c0_0] : memref<1x1xf32, #tpu.memory_space<smem>>
    %c0_1 = arith.constant 0 : index
    %c0_2 = arith.constant 0 : index
    %1 = vector.load %arg1[%c0_1, %c0_2] : memref<1x128xf32, #tpu.memory_space<vmem>>, vector<1x128xf32>
    %c0_3 = arith.constant 0 : index
    %c0_4 = arith.constant 0 : index
    %2 = vector.load %arg2[%c0_3, %c0_4] : memref<128x512xf32, #tpu.memory_space<vmem>>, vector<128x512xf32>
    %cst = arith.constant dense<0.000000e+00> : vector<1x512xf32>
    %3 = tpu.matmul %1, %2, %cst {dimension_numbers = #tpu.dot_dimension_numbers<[1], [0], [0], [1], [0, 0, 1, 1], [], []>} : vector<1x128xf32>, vector<128x512xf32>, vector<1x512xf32> -> vector<1x512xf32>
    %c0_5 = arith.constant 0 : index
    %c0_6 = arith.constant 0 : index
    %4 = vector.load %arg3[%c0_5, %c0_6] : memref<1x512xf32, #tpu.memory_space<vmem>>, vector<1x512xf32>
    %5 = arith.addf %3, %4 : vector<1x512xf32>
    %cst_7 = arith.constant 0.000000e+00 : f32
    %6 = vector.broadcast %cst_7 : f32 to vector<1x512xf32>
    %7 = arith.maximumf %5, %6 : vector<1x512xf32>
    %c0_8 = arith.constant 0 : index
    %c0_9 = arith.constant 0 : index
    %8 = vector.load %arg4[%c0_8, %c0_9] : memref<512x8xf32, #tpu.memory_space<vmem>>, vector<512x8xf32>
    %cst_10 = arith.constant dense<0.000000e+00> : vector<1x8xf32>
    %9 = tpu.matmul %7, %8, %cst_10 {dimension_numbers = #tpu.dot_dimension_numbers<[1], [0], [0], [1], [0, 0, 1, 1], [], []>} : vector<1x512xf32>, vector<512x8xf32>, vector<1x8xf32> -> vector<1x8xf32>
    %10 = vector.broadcast %0 : f32 to vector<1x8xf32>
    %11 = arith.addf %9, %10 : vector<1x8xf32>
    %c0_11 = arith.constant 0 : index
    %c0_12 = arith.constant 0 : index
    %12 = vector.load %arg6[%c0_11, %c0_12] : memref<1x8xf32, #tpu.memory_space<vmem>>, vector<1x8xf32>
    tpu.vector_store %arg6[%c0_11, %c0_12], %11 {strides = array<i32>} : memref<1x8xf32, #tpu.memory_space<vmem>>, vector<1x8xf32>,
    return
  }
  func.func @transform_0(%arg0: i32) -> (i32, i32) {
    %c0_i32 = arith.constant 0 : i32
    %c0_i32_0 = arith.constant 0 : i32
    return %arg0, %c0_i32 : i32, i32
  }
  func.func @transform_1(%arg0: i32) -> (i32, i32) {
    %c0_i32 = arith.constant 0 : i32
    %c0_i32_0 = arith.constant 0 : i32
    %c0_i32_1 = arith.constant 0 : i32
    return %c0_i32, %c0_i32_0 : i32, i32
  }
  func.func @transform_2(%arg0: i32) -> (i32, i32) {
    %c0_i32 = arith.constant 0 : i32
    %c0_i32_0 = arith.constant 0 : i32
    %c0_i32_1 = arith.constant 0 : i32
    return %c0_i32, %c0_i32_0 : i32, i32
  }
  func.func @transform_3(%arg0: i32) -> (i32, i32) {
    %c0_i32 = arith.constant 0 : i32
    %c0_i32_0 = arith.constant 0 : i32
    %c0_i32_1 = arith.constant 0 : i32
    return %c0_i32, %c0_i32_0 : i32, i32
  }
  func.func @transform_4(%arg0: i32) -> (i32, i32) {
    %c0_i32 = arith.constant 0 : i32
    %c0_i32_0 = arith.constant 0 : i32
    %c0_i32_1 = arith.constant 0 : i32
    return %c0_i32, %c0_i32_0 : i32, i32
  }
  func.func @transform_5(%arg0: i32) -> (i32, i32) {
    %c0_i32 = arith.constant 0 : i32
    %c0_i32_0 = arith.constant 0 : i32
    return %arg0, %c0_i32 : i32, i32
  }
}

</mosaic_0001>

<bundles_post_ra>
// kernel: tpu_custom_call.1
= control target key start
LH: loop header
LB: loop body
LE: loop exit
PB: predicated region body
PF: predicated region fallthrough
CT: control target
= control target key end

     0   :  { %v701_v7 = vmov 0.0   ;;  %s1138_s0 = inlined_call_operand.vmem [shape: f32[1,128], index: 0, kind: input, shape index: {}]   ;;  %s1139_s1 = inlined_call_operand.vmem [shape: f32[128,512], index: 1, kind: input, shape index: {}]   ;;  %s1140_s2 = inlined_call_operand.vmem [shape: f32[1,512], index: 2, kind: input, shape index: {}]   ;;  %s1141_s3 = inlined_call_operand.vmem [shape: f32[512,8], index: 3, kind: input, shape index: {}]   ;;  %s1142_s4 = inlined_call_operand.<no memory space> [shape: f32[1,1], index: 4, kind: input, shape index: {}]   ;;  %s1143_s5 = inlined_call_operand.hbm [shape: f32[1,8], index: 5, kind: output, shape index: {}]  }
   0x1   :  { %v25_v0 = vld [vmem:[%s1139_s1 + $0x8] sm:$0xff]  ;;  %v27_v2 = vld [vmem:[%s1139_s1 + $0x18] sm:$0xff]  ;;  %v24_v5 = vld [vmem:[%s1139_s1] sm:$0xff]  ;;  %174 = vmatprep.mubr.f32.mxu0 %v701_v7  ;;  %245 = vmatprep.mubr.f32.mxu1 %v701_v7 }
   0x2   :  { %v29_v1 = vld [vmem:[%s1139_s1 + $0x28] sm:$0xff]  ;;  %v31_v4 = vld [vmem:[%s1139_s1 + $0x38] sm:$0xff]  ;;  %v28_v6 = vld [vmem:[%s1139_s1 + $0x20] sm:$0xff] }
   0x3   :  { %v547_v3 = vpack.c.bf16 %v29_v1, %v25_v0  ;;  %v579_v8 = vpack.c.bf16 %v31_v4, %v27_v2  ;;  %v549_v9 = vpack.c.bf16 %v28_v6, %v24_v5  ;;  %v26_v10 = vld [vmem:[%s1139_s1 + $0x10] sm:$0xff]  ;;  %v33_v12 = vld [vmem:[%s1139_s1 + $0x48] sm:$0xff]  ;;  %v35_v15 = vld [vmem:[%s1139_s1 + $0x58] sm:$0xff] }
   0x4   :  { %v30_v11 = vld [vmem:[%s1139_s1 + $0x30] sm:$0xff]  ;;  %v37_v14 = vld [vmem:[%s1139_s1 + $0x68] sm:$0xff]  ;;  %v39_v16 = vld [vmem:[%s1139_s1 + $0x78] sm:$0xff] }
   0x5   :  { %548 = vmatprep.subr.bf16.mxu0 %v547_v3  ;;  %v581_v13 = vpack.c.bf16 %v30_v11, %v26_v10  ;;  %580 = vmatprep.subr.bf16.mxu1 %v579_v8  ;;  %v551_v17 = vpack.c.bf16 %v37_v14, %v33_v12  ;;  %v583_v18 = vpack.c.bf16 %v39_v16, %v35_v15  ;;  %v32_v19 = vld [vmem:[%s1139_s1 + $0x40] sm:$0xff]  ;;  %v34_v21 = vld [vmem:[%s1139_s1 + $0x50] sm:$0xff]  ;;  %v41_v24 = vld [vmem:[%s1139_s1 + $0x88] sm:$0xff] }
   0x6   :  { %550 = vmatpush1.bf16.msra.mxu0 %v549_v9  ;;  %v36_v20 = vld [vmem:[%s1139_s1 + $0x60] sm:$0xff]  ;;  %v38_v23 = vld [vmem:[%s1139_s1 + $0x70] sm:$0xff]  ;;  %v45_v25 = vld [vmem:[%s1139_s1 + $0xa8] sm:$0xff] }
   0x7   :  { %582 = vmatpush1.bf16.msra.mxu1 %v581_v13  ;;  %v553_v22 = vpack.c.bf16 %v36_v20, %v32_v19  ;;  %552 = vmatprep.subr.bf16.mxu0 %v551_v17  ;;  %v585_v26 = vpack.c.bf16 %v38_v23, %v34_v21  ;;  %v555_v27 = vpack.c.bf16 %v45_v25, %v41_v24  ;;  %v43_v28 = vld [vmem:[%s1139_s1 + $0x98] sm:$0xff]  ;;  %v40_v30 = vld [vmem:[%s1139_s1 + $0x80] sm:$0xff]  ;;  %v42_v33 = vld [vmem:[%s1139_s1 + $0x90] sm:$0xff] }
   0x8   :  { %584 = vmatprep.subr.bf16.mxu1 %v583_v18  ;;  %v47_v29 = vld [vmem:[%s1139_s1 + $0xb8] sm:$0xff]  ;;  %v44_v32 = vld [vmem:[%s1139_s1 + $0xa0] sm:$0xff]  ;;  %v46_v34 = vld [vmem:[%s1139_s1 + $0xb0] sm:$0xff] }
   0x9   :  { %v587_v31 = vpack.c.bf16 %v47_v29, %v43_v28  ;;  %v557_v35 = vpack.c.bf16 %v44_v32, %v40_v30  ;;  %v49_v36 = vld [vmem:[%s1139_s1 + $0xc8] sm:$0xff]  ;;  %v51_v38 = vld [vmem:[%s1139_s1 + $0xd8] sm:$0xff]  ;;  %v589_v39 = vpack.c.bf16 %v46_v34, %v42_v33  ;;  %v48_v42 = vld [vmem:[%s1139_s1 + $0xc0] sm:$0xff] }
   0xa   :  { %554 = vmatpush1.bf16.msra.mxu0 %v553_v22  ;;  %v53_v37 = vld [vmem:[%s1139_s1 + $0xe8] sm:$0xff]  ;;  %v55_v41 = vld [vmem:[%s1139_s1 + $0xf8] sm:$0xff]  ;;  %v52_v43 = vld [vmem:[%s1139_s1 + $0xe0] sm:$0xff] }
   0xb   :  { %586 = vmatpush1.bf16.msra.mxu1 %v585_v26  ;;  %556 = vmatprep.subr.bf16.mxu0 %v555_v27  ;;  %v559_v40 = vpack.c.bf16 %v53_v37, %v49_v36  ;;  %v591_v44 = vpack.c.bf16 %v55_v41, %v51_v38  ;;  %v50_v45 = vld [vmem:[%s1139_s1 + $0xd0] sm:$0xff]  ;;  %v57_v47 = vld [vmem:[%s1139_s1 + $0x108] sm:$0xff]  ;;  %v59_v49 = vld [vmem:[%s1139_s1 + $0x118] sm:$0xff]  ;;  %v561_v51 = vpack.c.bf16 %v52_v43, %v48_v42 }
   0xc   :  { %588 = vmatprep.subr.bf16.mxu1 %v587_v31  ;;  %v54_v46 = vld [vmem:[%s1139_s1 + $0xf0] sm:$0xff]  ;;  %v61_v48 = vld [vmem:[%s1139_s1 + $0x128] sm:$0xff]  ;;  %v63_v50 = vld [vmem:[%s1139_s1 + $0x138] sm:$0xff] }
   0xd   :  { %v593_v52 = vpack.c.bf16 %v54_v46, %v50_v45  ;;  %v563_v53 = vpack.c.bf16 %v61_v48, %v57_v47  ;;  %v56_v54 = vld [vmem:[%s1139_s1 + $0x100] sm:$0xff]  ;;  %v58_v56 = vld [vmem:[%s1139_s1 + $0x110] sm:$0xff]  ;;  %v595_v57 = vpack.c.bf16 %v63_v50, %v59_v49  ;;  %v65_v59 = vld [vmem:[%s1139_s1 + $0x148] sm:$0xff] }
   0xe   :  { %558 = vmatpush1.bf16.msra.mxu0 %v557_v35  ;;  %v60_v55 = vld [vmem:[%s1139_s1 + $0x120] sm:$0xff]  ;;  %v62_v58 = vld [vmem:[%s1139_s1 + $0x130] sm:$0xff]  ;;  %v69_v60 = vld [vmem:[%s1139_s1 + $0x168] sm:$0xff] }
   0xf   :  { %590 = vmatpush1.bf16.msra.mxu1 %v589_v39  ;;  %560 = vmatprep.subr.bf16.mxu0 %v559_v40  ;;  %v67_v61 = vld [vmem:[%s1139_s1 + $0x158] sm:$0xff]  ;;  %v565_v63 = vpack.c.bf16 %v60_v55, %v56_v54  ;;  %v597_v0 = vpack.c.bf16 %v62_v58, %v58_v56  ;;  %v567_v1 = vpack.c.bf16 %v69_v60, %v65_v59  ;;  %v64_v2 = vld [vmem:[%s1139_s1 + $0x140] sm:$0xff]  ;;  %v66_v4 = vld [vmem:[%s1139_s1 + $0x150] sm:$0xff] }
  0x10   :  { %592 = vmatprep.subr.bf16.mxu1 %v591_v44  ;;  %v71_v62 = vld [vmem:[%s1139_s1 + $0x178] sm:$0xff]  ;;  %v68_v3 = vld [vmem:[%s1139_s1 + $0x160] sm:$0xff]  ;;  %v70_v6 = vld [vmem:[%s1139_s1 + $0x170] sm:$0xff] }
  0x11   :  { %v599_v5 = vpack.c.bf16 %v71_v62, %v67_v61  ;;  %v73_v7 = vld [vmem:[%s1139_s1 + $0x188] sm:$0xff]  ;;  %v75_v9 = vld [vmem:[%s1139_s1 + $0x198] sm:$0xff]  ;;  %v569_v11 = vpack.c.bf16 %v68_v3, %v64_v2  ;;  %v601_v12 = vpack.c.bf16 %v70_v6, %v66_v4  ;;  %v72_v14 = vld [vmem:[%s1139_s1 + $0x180] sm:$0xff] }
  0x12   :  { %562 = vmatpush1.bf16.msra.mxu0 %v561_v51  ;;  %v77_v8 = vld [vmem:[%s1139_s1 + $0x1a8] sm:$0xff]  ;;  %v79_v10 = vld [vmem:[%s1139_s1 + $0x1b8] sm:$0xff]  ;;  %v76_v15 = vld [vmem:[%s1139_s1 + $0x1a0] sm:$0xff] }
  0x13   :  { %594 = vmatpush1.bf16.msra.mxu1 %v593_v52  ;;  %564 = vmatprep.subr.bf16.mxu0 %v563_v53  ;;  %v571_v13 = vpack.c.bf16 %v77_v8, %v73_v7  ;;  %v74_v16 = vld [vmem:[%s1139_s1 + $0x190] sm:$0xff]  ;;  %v603_v17 = vpack.c.bf16 %v79_v10, %v75_v9  ;;  %v81_v19 = vld [vmem:[%s1139_s1 + $0x1c8] sm:$0xff]  ;;  %v83_v21 = vld [vmem:[%s1139_s1 + $0x1d8] sm:$0xff]  ;;  %v573_v23 = vpack.c.bf16 %v76_v15, %v72_v14 }
  0x14   :  { %596 = vmatprep.subr.bf16.mxu1 %v595_v57  ;;  %v78_v18 = vld [vmem:[%s1139_s1 + $0x1b0] sm:$0xff]  ;;  %v85_v20 = vld [vmem:[%s1139_s1 + $0x1e8] sm:$0xff]  ;;  %v87_v22 = vld [vmem:[%s1139_s1 + $0x1f8] sm:$0xff] }
  0x15   :  { %v605_v24 = vpack.c.bf16 %v78_v18, %v74_v16  ;;  %v575_v25 = vpack.c.bf16 %v85_v20, %v81_v19  ;;  %v80_v26 = vld [vmem:[%s1139_s1 + $0x1c0] sm:$0xff]  ;;  %v82_v28 = vld [vmem:[%s1139_s1 + $0x1d0] sm:$0xff]  ;;  %v607_v29 = vpack.c.bf16 %v87_v22, %v83_v21  ;;  %v273_v32 = vld [vmem:[%s1141_s3 + $0x88] sm:$0xff] }
  0x16   :  { %566 = vmatpush1.bf16.msra.mxu0 %v565_v63  ;;  %v84_v27 = vld [vmem:[%s1139_s1 + $0x1e0] sm:$0xff]  ;;  %v86_v30 = vld [vmem:[%s1139_s1 + $0x1f0] sm:$0xff]  ;;  %v305_v34 = vld [vmem:[%s1141_s3 + $0x188] sm:$0xff] }
  0x17   :  { %598 = vmatpush1.bf16.msra.mxu1 %v597_v0  ;;  %568 = vmatprep.subr.bf16.mxu0 %v567_v1  ;;  %v272_v31 = vld [vmem:[%s1141_s3 + $0x80] sm:$0xff]  ;;  %v577_v35 = vpack.c.bf16 %v84_v27, %v80_v26  ;;  %v609_v36 = vpack.c.bf16 %v86_v30, %v82_v28  ;;  %v257_v39 = vld [vmem:[%s1141_s3 + $0x8] sm:$0xff]  ;;  %v274_v43 = vld [vmem:[%s1141_s3 + $0x90] sm:$0xff] }
  0x18   :  { %600 = vmatprep.subr.bf16.mxu1 %v599_v5  ;;  %v304_v33 = vld [vmem:[%s1141_s3 + $0x180] sm:$0xff]  ;;  %v611_v37 = vpack.c.bf16 %v273_v32, %v272_v31  ;;  %v289_v42 = vld [vmem:[%s1141_s3 + $0x108] sm:$0xff]  ;;  %v275_v44 = vld [vmem:[%s1141_s3 + $0x98] sm:$0xff] }
  0x19   :  { %v256_v38 = vld [vmem:[%s1141_s3] sm:$0xff]  ;;  %v643_v41 = vpack.c.bf16 %v305_v34, %v304_v33  ;;  %v306_v45 = vld [vmem:[%s1141_s3 + $0x190] sm:$0xff]  ;;  %v307_v46 = vld [vmem:[%s1141_s3 + $0x198] sm:$0xff]  ;;  %v615_v50 = vpack.c.bf16 %v275_v44, %v274_v43 }
  0x1a   :  { %570 = vmatpush1.bf16.msra.mxu0 %v569_v11  ;;  %v288_v40 = vld [vmem:[%s1141_s3 + $0x100] sm:$0xff]  ;;  %v613_v48 = vpack.c.bf16 %v257_v39, %v256_v38  ;;  %v258_v51 = vld [vmem:[%s1141_s3 + $0x10] sm:$0xff]  ;;  %v259_v52 = vld [vmem:[%s1141_s3 + $0x18] sm:$0xff]  ;;  %v647_v54 = vpack.c.bf16 %v307_v46, %v306_v45 }
  0x1b   :  { %602 = vmatpush1.bf16.msra.mxu1 %v601_v12  ;;  %572 = vmatprep.subr.bf16.mxu0 %v571_v13  ;;  %v23_v47 = vld [vmem:[%s1138_s0] sm:$0x1]  ;;  %v645_v49 = vpack.c.bf16 %v289_v42, %v288_v40  ;;  %v290_v53 = vld [vmem:[%s1141_s3 + $0x110] sm:$0xff]  ;;  %v291_v55 = vld [vmem:[%s1141_s3 + $0x118] sm:$0xff]  ;;  %v617_v60 = vpack.c.bf16 %v259_v52, %v258_v51 }
  0x1c   :  { %604 = vmatprep.subr.bf16.mxu1 %v603_v17  ;;  %v276_v56 = vld [vmem:[%s1141_s3 + $0xa0] sm:$0xff]  ;;  %v277_v57 = vld [vmem:[%s1141_s3 + $0xa8] sm:$0xff]  ;;  %v649_v61 = vpack.c.bf16 %v291_v55, %v290_v53  ;;  %v278_v4 = vld [vmem:[%s1141_s3 + $0xb0] sm:$0xff] }
  0x1d   :  { %v308_v58 = vld [vmem:[%s1141_s3 + $0x1a0] sm:$0xff]  ;;  %v309_v59 = vld [vmem:[%s1141_s3 + $0x1a8] sm:$0xff]  ;;  %v619_v62 = vpack.c.bf16 %v277_v57, %v276_v56  ;;  %v279_v5 = vld [vmem:[%s1141_s3 + $0xb8] sm:$0xff] }
  0x1e   :  { %574 = vmatpush1.bf16.msra.mxu0 %v573_v23  ;;  %v260_v63 = vld [vmem:[%s1141_s3 + $0x20] sm:$0xff]  ;;  %v261_v0 = vld [vmem:[%s1141_s3 + $0x28] sm:$0xff]  ;;  %v651_v2 = vpack.c.bf16 %v309_v59, %v308_v58  ;;  %v310_v6 = vld [vmem:[%s1141_s3 + $0x1b0] sm:$0xff] }
  0x1f   :  { %606 = vmatpush1.bf16.msra.mxu1 %v605_v24  ;;  %576 = vmatprep.subr.bf16.mxu0 %v575_v25  ;;  %v292_v1 = vld [vmem:[%s1141_s3 + $0x120] sm:$0xff]  ;;  %v293_v3 = vld [vmem:[%s1141_s3 + $0x128] sm:$0xff]  ;;  %v311_v7 = vld [vmem:[%s1141_s3 + $0x1b8] sm:$0xff] }
  0x20   :  { %608 = vmatprep.subr.bf16.mxu1 %v607_v29 }
  0x22   :  { %578 = vmatpush1.bf16.msra.mxu0 %v577_v35 }
  0x23   :  { %610 = vmatpush1.bf16.msra.mxu1 %v609_v36  ;;  %612 = vmatprep.subr.bf16.mxu0 %v611_v37 }
  0x24   :  { %644 = vmatprep.subr.bf16.mxu1 %v643_v41 }
  0x25   :  { %175 = vmatmul.mubr.f32.vlgmr.msra.gmra.mrb[0].mxu0 %v23_v47 }
  0x26   :  { %246 = vmatmul.mubr.f32.vlgmr.msra.gmra.mrb[0].mxu1 %v23_v47  ;;  %614 = vmatpush3.bf16.msra.mxu0 %v613_v48 }
  0x27   :  { %646 = vmatpush3.bf16.msra.mxu1 %v645_v49  ;;  %616 = vmatprep.subr.bf16.mxu0 %v615_v50 }
  0x28   :  { %648 = vmatprep.subr.bf16.mxu1 %v647_v54 }
  0x29   :  { %11 = vsyncpa [#allocation4], 0  ;;  %v621_v8 = vpack.c.bf16 %v261_v0, %v260_v63  ;;  %v653_v9 = vpack.c.bf16 %v293_v3, %v292_v1  ;;  %v623_v10 = vpack.c.bf16 %v279_v5, %v278_v4  ;;  %v262_v11 = vld [vmem:[%s1141_s3 + $0x30] sm:$0xff]  ;;  %v263_v12 = vld [vmem:[%s1141_s3 + $0x38] sm:$0xff]  ;;  %v655_v14 = vpack.c.bf16 %v311_v7, %v310_v6  ;;  %s702_s19 = smov [#allocation3]  }
  0x2a   :  { %618 = vmatpush3.bf16.msra.mxu0 %v617_v60  ;;  %v294_v13 = vld [vmem:[%s1141_s3 + $0x130] sm:$0xff]  ;;  %v295_v15 = vld [vmem:[%s1141_s3 + $0x138] sm:$0xff]  ;;  %v280_v16 = vld [vmem:[%s1141_s3 + $0xc0] sm:$0xff]  ;;  %v625_v20 = vpack.c.bf16 %v263_v12, %v262_v11  ;;  %s469_s20 = sshll.u32 %s702_s19, 4  ;;  %vm461_vm0 = vcmask 57344   ;;  %s470_s20 = int_to_ptr.vmem [resolvable:$true] %s469_s20 }
  0x2b   :  { %650 = vmatpush3.bf16.msra.mxu1 %v649_v61  ;;  %620 = vmatprep.subr.bf16.mxu0 %v619_v62  ;;  %v281_v17 = vld [vmem:[%s1141_s3 + $0xc8] sm:$0xff]  ;;  %v312_v18 = vld [vmem:[%s1141_s3 + $0x1c0] sm:$0xff]  ;;  %v657_v21 = vpack.c.bf16 %v295_v15, %v294_v13  ;;  %v282_v28 = vld [vmem:[%s1141_s3 + $0xd0] sm:$0xff]  ;;  %s677_s21 = scalar_lea.vmem %s470_s20, 16  ;;  %s681_s22 = scalar_lea.vmem %s470_s20, 32 }
  0x2c   :  { %652 = vmatprep.subr.bf16.mxu1 %v651_v2  ;;  %v313_v19 = vld [vmem:[%s1141_s3 + $0x1c8] sm:$0xff]  ;;  %v627_v22 = vpack.c.bf16 %v281_v17, %v280_v16  ;;  %v264_v23 = vld [vmem:[%s1141_s3 + $0x40] sm:$0xff]  ;;  %v283_v29 = vld [vmem:[%s1141_s3 + $0xd8] sm:$0xff]  ;;  %v90_v2 = vlaneseq  ;;  %p678_p0 = scmp.ne.s32.totalorder %s470_s20, %s677_s21  ;;  %p682_p1 = scmp.lt.s32.totalorder %s470_s20, %s470_s20 }
  0x2d   :  { %v265_v24 = vld [vmem:[%s1141_s3 + $0x48] sm:$0xff]  ;;  %v296_v25 = vld [vmem:[%s1141_s3 + $0x140] sm:$0xff]  ;;  %v659_v26 = vpack.c.bf16 %v313_v19, %v312_v18  ;;  %v314_v30 = vld [vmem:[%s1141_s3 + $0x1d0] sm:$0xff]  ;;  %v631_v34 = vpack.c.bf16 %v283_v29, %v282_v28  ;;  %p683_p2 = scmp.lt.s32.totalorder %s681_s22, %s677_s21 }
  0x2e   :  { %622 = vmatpush3.bf16.msra.mxu0 %v621_v8  ;;  %v297_v27 = vld [vmem:[%s1141_s3 + $0x148] sm:$0xff]  ;;  %v315_v31 = vld [vmem:[%s1141_s3 + $0x1d8] sm:$0xff]  ;;  %v629_v32 = vpack.c.bf16 %v265_v24, %v264_v23  ;;  %v266_v35 = vld [vmem:[%s1141_s3 + $0x50] sm:$0xff]  ;;  %v91_v3 = vshrl.u32 %v90_v2, 7 }
  0x2f   :  { %654 = vmatpush3.bf16.msra.mxu1 %v653_v9  ;;  %624 = vmatprep.subr.bf16.mxu0 %v623_v10  ;;  %v661_v33 = vpack.c.bf16 %v297_v27, %v296_v25  ;;  %v267_v36 = vld [vmem:[%s1141_s3 + $0x58] sm:$0xff]  ;;  %v298_v37 = vld [vmem:[%s1141_s3 + $0x150] sm:$0xff]  ;;  %v663_v38 = vpack.c.bf16 %v315_v31, %v314_v30  ;;  %v284_v40 = vld [vmem:[%s1141_s3 + $0xe0] sm:$0xff]  ;;  %v320_v27 = vstv %s1142_s4  ;;  %p684_p3 = por %p683_p2, %p682_p1 }
  0x30   :  { %656 = vmatprep.subr.bf16.mxu1 %v655_v14  ;;  %v299_v39 = vld [vmem:[%s1141_s3 + $0x158] sm:$0xff]  ;;  %v285_v41 = vld [vmem:[%s1141_s3 + $0xe8] sm:$0xff]  ;;  %v316_v42 = vld [vmem:[%s1141_s3 + $0x1e0] sm:$0xff]  ;;  %v633_v44 = vpack.c.bf16 %v267_v36, %v266_v35  ;;  %v92_v4 = vsub.s32 0, %v91_v3  ;;  %v100_v6 = vsub.s32 2, %v91_v3  ;;  %v96_v7 = vsub.s32 1, %v91_v3 }
  0x31   :  { %v317_v43 = vld [vmem:[%s1141_s3 + $0x1e8] sm:$0xff]  ;;  %v665_v45 = vpack.c.bf16 %v299_v39, %v298_v37  ;;  %v635_v46 = vpack.c.bf16 %v285_v41, %v284_v40  ;;  %v268_v48 = vld [vmem:[%s1141_s3 + $0x60] sm:$0xff]  ;;  %v286_v54 = vld [vmem:[%s1141_s3 + $0xf0] sm:$0xff]  ;;  %v104_v8 = vsub.s32 3, %v91_v3  ;;  %p685_p4 = pnand %p684_p3, %p678_p0 }
  0x32   :  { %626 = vmatpush3.bf16.msra.mxu0 %v625_v20  ;;  %v667_v47 = vpack.c.bf16 %v317_v43, %v316_v42  ;;  %v269_v49 = vld [vmem:[%s1141_s3 + $0x68] sm:$0xff]  ;;  %v300_v50 = vld [vmem:[%s1141_s3 + $0x160] sm:$0xff]  ;;  %v287_v55 = vld [vmem:[%s1141_s3 + $0xf8] sm:$0xff] }
  0x33   :  { %658 = vmatpush3.bf16.msra.mxu1 %v657_v21  ;;  %628 = vmatprep.subr.bf16.mxu0 %v627_v22  ;;  %v637_v51 = vpack.c.bf16 %v269_v49, %v268_v48  ;;  %v301_v52 = vld [vmem:[%s1141_s3 + $0x168] sm:$0xff]  ;;  %v318_v56 = vld [vmem:[%s1141_s3 + $0x1f0] sm:$0xff]  ;;  %v639_v57 = vpack.c.bf16 %v287_v55, %v286_v54  ;;  %v319_v58 = vld [vmem:[%s1141_s3 + $0x1f8] sm:$0xff] }
  0x34   :  { %660 = vmatprep.subr.bf16.mxu1 %v659_v26  ;;  %v669_v53 = vpack.c.bf16 %v301_v52, %v300_v50  ;;  %v270_v59 = vld [vmem:[%s1141_s3 + $0x70] sm:$0xff]  ;;  %v271_v60 = vld [vmem:[%s1141_s3 + $0x78] sm:$0xff]  ;;  %v671_v61 = vpack.c.bf16 %v319_v58, %v318_v56  ;;  %v88_v5 = vld [vmem:[%s1140_s2] sm:$0xf] }
  0x35   :  { %v641_v62 = vpack.c.bf16 %v271_v60, %v270_v59  ;;  %v302_v63 = vld [vmem:[%s1141_s3 + $0x170] sm:$0xff]  ;;  %v303_v0 = vld [vmem:[%s1141_s3 + $0x178] sm:$0xff]  ;;  %v93_v9 = vrot.slane %v88_v5, %v92_v4  ;;  %v101_v10 = vrot.slane %v88_v5, %v100_v6  ;;  %v97_v11 = vrot.slane %v88_v5, %v96_v7 }
  0x36   :  { %630 = vmatpush3.bf16.msra.mxu0 %v629_v32  ;;  %v673_v1 = vpack.c.bf16 %v303_v0, %v302_v63  ;;  %v105_v12 = vrot.slane %v88_v5, %v104_v8 }
  0x37   :  { %662 = vmatpush3.bf16.msra.mxu1 %v661_v33  ;;  %632 = vmatprep.subr.bf16.mxu0 %v631_v34 }
  0x38   :  { %664 = vmatprep.subr.bf16.mxu1 %v663_v38 }
  0x3a   :  { %634 = vmatpush3.bf16.msra.mxu0 %v633_v44 }
  0x3b   :  { %666 = vmatpush3.bf16.msra.mxu1 %v665_v45  ;;  %636 = vmatprep.subr.bf16.mxu0 %v635_v46 }
  0x3c   :  { %668 = vmatprep.subr.bf16.mxu1 %v667_v47 }
  0x3e   :  { %638 = vmatpush3.bf16.msra.mxu0 %v637_v51 }
  0x3f   :  { %670 = vmatpush3.bf16.msra.mxu1 %v669_v53  ;;  %640 = vmatprep.subr.bf16.mxu0 %v639_v57 }
  0x40   :  { %672 = vmatprep.subr.bf16.mxu1 %v671_v61 }
  0x42   :  { %642 = vmatpush3.bf16.msra.mxu0 %v641_v62 }
  0x43   :  { %674 = vmatpush3.bf16.msra.mxu1 %v673_v1 }
  0xf8   :  { %v176_v13 = vpop.f32.mrb[0].mxu0 }
  0xf9   :  { %v177_v14 = vadd.f32 %v176_v13, %v93_v9  ;;  %v247_v15 = vpop.f32.mrb[0].mxu1  ;;  %v178_v16 = vpop.f32.mrb[1].mxu0 }
  0xfa   :  { %v248_v17 = vadd.f32 %v247_v15, %v101_v10  ;;  %v179_v18 = vadd.f32 %v178_v16, %v97_v11  ;;  %v249_v19 = vpop.f32.mrb[1].mxu1 }
  0xfb   :  { %v250_v20 = vadd.f32 %v249_v19, %v105_v12  ;;  %v252_v23 = vmax.f32 %v177_v14, 0.0 }
  0xfc   :  { %v254_v21 = vmax.f32 %v248_v17, 0.0  ;;  %v253_v22 = vmax.f32 %v179_v18, 0.0 }
  0xfd   :  { %v255_v24 = vmax.f32 %v250_v20, 0.0 }
  0xfe   :  { %385 = vmatprep.mubr.f32.mxu0 %v253_v22 }
  0xff   :  { %455 = vmatprep.mubr.f32.mxu1 %v255_v24  ;;  %386 = vmatmul.mubr.f32.vlgmr.msra.gmra.mrb[2].mxu0 %v252_v23 }
 0x100   :  { %456 = vmatmul.mubr.f32.vlgmr.msra.gmra.mrb[2].mxu1 %v254_v21 }
 0x1d2   :  { %v509_v25 = vpop.f32.mrb[2].mxu0 }
 0x1d3   :  { %v544_v26 = vpop.f32.mrb[2].mxu1  ;;  %v510_v28 = vpop.f32.mrb[3].mxu0 }
 0x1d4   :  { %v511_v29 = vadd.f32 %v510_v28, %v509_v25  ;;  %v545_v30 = vpop.f32.mrb[3].mxu1 }
 0x1d5   :  { %v546_v31 = vadd.f32 %v545_v30, %v544_v26 }
 0x1d6   :  { %v388_v32 = vadd.f32 %v511_v29, %v320_v27 }
 0x1d8   :  { %v458_v33 = vadd.f32 %v546_v31, %v388_v32 }
 0x1da   :  { %462 = vst.msk [vmem:[#allocation3] sm:$0x1] %vm461_vm0, %v458_v33 }
 0x1db   :  { %688 = shalt.err (!%p685_p4)
}
 0x1dc   :  { %s689_s24 = scalar_lea.hbm %s1143_s5, 16 }
 0x1dd   :  { %p690_p5 = scmp.ne.s32.totalorder %s1143_s5, %s689_s24  ;;  %p693_p6 = scmp.lt.u32.totalorder %s689_s24, %s1143_s5 }
 0x1df   :  { %p695_p7 = pnand %p693_p6, %p690_p5 }
 0x1e1   :  { %698 = shalt.err (!%p695_p7)
}
 0x1e2   :  { %472 = dma.vmem_to_hbm [thread:$0]  %s470_s20, 16, %s1143_s5, [#allocation4]  }
 0x1e3   :  { %699 = dma.done.wait [#allocation4], 16  }
 0x1e4   :  { %700 = vsyncadd [#allocation4], 4294967280 }
 0x1e5   :  { %476 = vsyncpa [#allocation4], 1 }

</bundles_post_ra>
